<compile_context>
chip_gen: v6e
topology: v6e:2x2x1
jax: 0.10.0
libtpu: 0.0.40
codegen_flags: <defaults>
</compile_context>

<pallas_src>
import functools

import jax
import jax.numpy as jnp
from jax.experimental import pallas as pl
from jax.experimental.pallas import tpu as pltpu


def _kd_kernel(y_s_ref, y_t_ref, partial_ref, *, inv_T, B, tile_b, needs_mask):
    # (TILE_B, C) tiles; class axis (softmax axis) on the lane axis.
    ys = y_s_ref[...].astype(jnp.float32) * inv_T
    yt = y_t_ref[...].astype(jnp.float32) * inv_T

    # Student log-softmax over classes.
    ys_max = jnp.max(ys, axis=1, keepdims=True)
    ys_shift = ys - ys_max
    log_z_s = jnp.log(jnp.sum(jnp.exp(ys_shift), axis=1, keepdims=True))
    log_p_s = ys_shift - log_z_s

    # Teacher softmax / log-softmax.
    yt_max = jnp.max(yt, axis=1, keepdims=True)
    yt_shift = yt - yt_max
    exp_t = jnp.exp(yt_shift)
    z_t = jnp.sum(exp_t, axis=1, keepdims=True)
    log_p_t = yt_shift - jnp.log(z_t)

    # Row KL:  sum_c p_t * (log p_t - log p_s)
    #        = (1/z_t) * sum_c exp_t * (log p_t - log p_s)
    # -> only TILE_B reciprocals (EUP approx), never a per-element divide.
    row_num = jnp.sum(exp_t * (log_p_t - log_p_s), axis=1, keepdims=True)
    row_kl = row_num * pl.reciprocal(z_t, approx=True)            # (tile_b, 1)

    if needs_mask:
        # Last batch tile may extend past the true batch; zero padded rows.
        row = pl.program_id(0) * tile_b + jax.lax.broadcasted_iota(
            jnp.int32, (tile_b, 1), 0)
        row_kl = jnp.where(row < B, row_kl, 0.0)

    # Lane-dense per-tile partial sum; /B and *T^2 applied in the wrapper.
    tile_sum = jnp.sum(row_kl)
    partial_ref[...] = jnp.broadcast_to(tile_sum, (1, 1, 128))


def distill_kl(y_s, y_t, T, *, tile_b=None):
    """KD loss: KL(softmax(y_t/T) || softmax(y_s/T)) * T^2, batch-mean."""
    assert y_s.shape == y_t.shape and y_s.ndim == 2
    B, C = y_s.shape
    itemsize = y_s.dtype.itemsize

    if tile_b is None:
        # ~4 MiB per input block => 2 inputs x 2 pipeline buffers ~ 16 MiB,
        # comfortably inside the smallest VMEM budget (v7x: 64 MiB per TC),
        # large enough to be near the HBM roofline on v5e/v6e/v7x.
        target_block_bytes = 4 << 20
        rows = max(8, (target_block_bytes // (C * itemsize)) // 8 * 8)
        tile_b = int(min(B, rows))
    tile_b = int(tile_b)
    if tile_b >= B:
        tile_b = B                        # full-dim batch block: always legal
    else:
        tile_b = max(8, (tile_b // 8) * 8)  # partial tiles must be 8-row aligned

    num_tiles = pl.cdiv(B, tile_b)
    needs_mask = (B % tile_b) != 0

    block_bytes = tile_b * C * itemsize
    vmem_limit = int(min(max(4 * block_bytes + (4 << 20), 16 << 20), 48 << 20))

    kernel = functools.partial(
        _kd_kernel,
        inv_T=1.0 / float(T),
        B=B,
        tile_b=tile_b,
        needs_mask=needs_mask,
    )

    partials = pl.pallas_call(
        kernel,
        grid=(num_tiles,),
        in_specs=[
            pl.BlockSpec((tile_b, C), lambda i: (i, 0)),
            pl.BlockSpec((tile_b, C), lambda i: (i, 0)),
        ],
        out_specs=pl.BlockSpec((1, 1, 128), lambda i: (i, 0, 0)),
        out_shape=jax.ShapeDtypeStruct((num_tiles, 1, 128), jnp.float32),
        compiler_params=pltpu.CompilerParams(
            dimension_semantics=("parallel",),
            vmem_limit_bytes=vmem_limit,
        ),
    )(y_s, y_t)

    # Final tiny reduction + batchmean + T^2 scaling in plain JAX.
    return jnp.sum(partials[:, 0, 0]) * (float(T) * float(T) / B)


def _reference(y_s, y_t, T):
    ys = y_s.astype(jnp.float32) / T
    yt = y_t.astype(jnp.float32) / T
    log_p_s = jax.nn.log_softmax(ys, axis=1)
    p_t = jax.nn.softmax(yt, axis=1)
    log_p_t = jax.nn.log_softmax(yt, axis=1)
    return jnp.sum(p_t * (log_p_t - log_p_s)) / y_s.shape[0] * T ** 2


if __name__ == "__main__":
    T = 4.0
    key = jax.random.PRNGKey(0)
    k1, k2, k3, k4 = jax.random.split(key, 4)

    # Case 1: small single-tile problem, f32 logits (B=8, C=128).
    y_s = jax.random.normal(k1, (8, 128), dtype=jnp.float32)
    y_t = jax.random.normal(k2, (8, 128), dtype=jnp.float32)
    loss = distill_kl(y_s, y_t, T)
    jax.block_until_ready(loss)
    ref = _reference(y_s, y_t, T)
    assert jnp.allclose(loss, ref, rtol=2e-3, atol=1e-5), (loss, ref)

    # Case 2: multi-tile batch grid with a ragged last tile (masking path),
    # bf16 logits cast to f32 inside the kernel (B=20, C=256, TILE_B=8).
    y_s2 = jax.random.normal(k3, (20, 256), dtype=jnp.bfloat16)
    y_t2 = jax.random.normal(k4, (20, 256), dtype=jnp.bfloat16)
    loss2 = distill_kl(y_s2, y_t2, T, tile_b=8)
    jax.block_until_ready(loss2)
    ref2 = _reference(y_s2, y_t2, T)
    assert jnp.allclose(loss2, ref2, rtol=2e-3, atol=1e-4), (loss2, ref2)

    print("KERNEL_OK")
</pallas_src>

<mosaic_0001>
module attributes {stable_mosaic.version = 11 : i64} {
  func.func @_kd_kernel(%arg0: i32, %arg1: memref<8x128xf32, #tpu.memory_space<vmem>>, %arg2: memref<8x128xf32, #tpu.memory_space<vmem>>, %arg3: memref<1x1x128xf32, #tpu.memory_space<vmem>>) attributes {dimension_semantics = [#tpu.dimension_semantics<parallel>], iteration_bounds = array<i64: 1>, scalar_prefetch = 0 : i64, scratch_operands = 0 : i64, tpu.core_type = #tpu.core_type<tc>, window_params = [{transform_indices = @transform_0, window_bounds = array<i64: 8, 128>}, {transform_indices = @transform_1, window_bounds = array<i64: 8, 128>}, {transform_indices = @transform_2, window_bounds = array<i64: 1, 1, 128>}]} {
    %c0 = arith.constant 0 : index
    %c0_0 = arith.constant 0 : index
    %0 = vector.load %arg1[%c0, %c0_0] : memref<8x128xf32, #tpu.memory_space<vmem>>, vector<8x128xf32>
    %cst = arith.constant 2.500000e-01 : f32
    %1 = vector.broadcast %cst : f32 to vector<8x128xf32>
    %2 = arith.mulf %0, %1 : vector<8x128xf32>
    %c0_1 = arith.constant 0 : index
    %c0_2 = arith.constant 0 : index
    %3 = vector.load %arg2[%c0_1, %c0_2] : memref<8x128xf32, #tpu.memory_space<vmem>>, vector<8x128xf32>
    %cst_3 = arith.constant 2.500000e-01 : f32
    %4 = vector.broadcast %cst_3 : f32 to vector<8x128xf32>
    %5 = arith.mulf %3, %4 : vector<8x128xf32>
    %cst_4 = arith.constant dense<0xFF800000> : vector<8xf32>
    %6 = vector.multi_reduction <maximumf>, %2, %cst_4 [1] : vector<8x128xf32> to vector<8xf32>
    %7 = vector.shape_cast %6 : vector<8xf32> to vector<8x1xf32>
    %8 = vector.broadcast %7 : vector<8x1xf32> to vector<8x128xf32>
    %9 = arith.subf %2, %8 : vector<8x128xf32>
    %10 = math.exp %9 : vector<8x128xf32>
    %cst_5 = arith.constant dense<0.000000e+00> : vector<8xf32>
    %11 = vector.multi_reduction <add>, %10, %cst_5 [1] : vector<8x128xf32> to vector<8xf32>
    %12 = vector.shape_cast %11 : vector<8xf32> to vector<8x1xf32>
    %13 = math.log %12 : vector<8x1xf32>
    %14 = vector.broadcast %13 : vector<8x1xf32> to vector<8x128xf32>
    %15 = arith.subf %9, %14 : vector<8x128xf32>
    %cst_6 = arith.constant dense<0xFF800000> : vector<8xf32>
    %16 = vector.multi_reduction <maximumf>, %5, %cst_6 [1] : vector<8x128xf32> to vector<8xf32>
    %17 = vector.shape_cast %16 : vector<8xf32> to vector<8x1xf32>
    %18 = vector.broadcast %17 : vector<8x1xf32> to vector<8x128xf32>
    %19 = arith.subf %5, %18 : vector<8x128xf32>
    %20 = math.exp %19 : vector<8x128xf32>
    %cst_7 = arith.constant dense<0.000000e+00> : vector<8xf32>
    %21 = vector.multi_reduction <add>, %20, %cst_7 [1] : vector<8x128xf32> to vector<8xf32>
    %22 = vector.shape_cast %21 : vector<8xf32> to vector<8x1xf32>
    %23 = math.log %22 : vector<8x1xf32>
    %24 = vector.broadcast %23 : vector<8x1xf32> to vector<8x128xf32>
    %25 = arith.subf %19, %24 : vector<8x128xf32>
    %26 = arith.subf %25, %15 : vector<8x128xf32>
    %27 = arith.mulf %20, %26 : vector<8x128xf32>
    %cst_8 = arith.constant dense<0.000000e+00> : vector<8xf32>
    %28 = vector.multi_reduction <add>, %27, %cst_8 [1] : vector<8x128xf32> to vector<8xf32>
    %29 = vector.shape_cast %28 : vector<8xf32> to vector<8x1xf32>
    %30 = tpu.reciprocal %22 {approx = true} : vector<8x1xf32> -> vector<8x1xf32>
    %31 = arith.mulf %29, %30 : vector<8x1xf32>
    %32 = vector.shape_cast %31 : vector<8x1xf32> to vector<1x8x1xf32>
    %cst_9 = arith.constant dense<0.000000e+00> : vector<1xf32>
    %33 = vector.multi_reduction <add>, %32, %cst_9 [1, 2] : vector<1x8x1xf32> to vector<1xf32>
    %34 = vector.shape_cast %33 : vector<1xf32> to vector<1x1x1xf32>
    %35 = vector.extract %34[0, 0, 0] : f32 from vector<1x1x1xf32>
    %36 = vector.broadcast %35 : f32 to vector<1x1x128xf32>
    %c0_10 = arith.constant 0 : index
    %c0_11 = arith.constant 0 : index
    %c0_12 = arith.constant 0 : index
    %37 = vector.load %arg3[%c0_10, %c0_11, %c0_12] : memref<1x1x128xf32, #tpu.memory_space<vmem>>, vector<1x1x128xf32>
    tpu.vector_store %arg3[%c0_10, %c0_11, %c0_12], %36 {strides = array<i32>} : memref<1x1x128xf32, #tpu.memory_space<vmem>>, vector<1x1x128xf32>,
    return
  }
  func.func @transform_0(%arg0: i32) -> (i32, i32) {
    %c0_i32 = arith.constant 0 : i32
    %c0_i32_0 = arith.constant 0 : i32
    return %arg0, %c0_i32 : i32, i32
  }
  func.func @transform_1(%arg0: i32) -> (i32, i32) {
    %c0_i32 = arith.constant 0 : i32
    %c0_i32_0 = arith.constant 0 : i32
    return %arg0, %c0_i32 : i32, i32
  }
  func.func @transform_2(%arg0: i32) -> (i32, i32, i32) {
    %c0_i32 = arith.constant 0 : i32
    %c0_i32_0 = arith.constant 0 : i32
    %c0_i32_1 = arith.constant 0 : i32
    return %arg0, %c0_i32, %c0_i32_0 : i32, i32, i32
  }
}

</mosaic_0001>

<bundles_post_ra>
// kernel: tpu_custom_call.1
= control target key start
LH: loop header
LB: loop body
LE: loop exit
PB: predicated region body
PF: predicated region fallthrough
CT: control target
= control target key end

     0   :  { %7 = vsyncpa [#allocation3], 0  ;;  %s203_s0 = inlined_call_operand.hbm [shape: f32[8,128], index: 0, kind: input, shape index: {}]   ;;  %s204_s1 = inlined_call_operand.hbm [shape: f32[8,128], index: 1, kind: input, shape index: {}]   ;;  %s205_s2 = inlined_call_operand.hbm [shape: f32[1,1,128], index: 2, kind: output, shape index: {}]  }
   0x1   :  { %8 = vsyncpa [#allocation6], 0 }
   0x2   :  { %9 = vsyncpa [#allocation4], 0  ;;  %s176_s9 = smov [#allocation2]   ;;  %s177_s11 = smov [#allocation5]  }
   0x3   :  { %s16_s10 = sshll.u32 %s176_s9, 4  ;;  %s26_s12 = sshll.u32 %s177_s11, 4  ;;  %s17_s10 = int_to_ptr.vmem [resolvable:$true] %s16_s10  ;;  %s27_s12 = int_to_ptr.vmem [resolvable:$true] %s26_s12 }
   0x4   :  { %s118_s13 = scalar_lea.vmem %s17_s10, 128  ;;  %p123_p1 = scmp.lt.s32.totalorder %s17_s10, %s17_s10 }
   0x5   :  { %p119_p0 = scmp.ne.s32.totalorder %s17_s10, %s118_s13  ;;  %p124_p2 = scmp.lt.s32.totalorder %s118_s13, %s118_s13 }
   0x7   :  { %p125_p3 = por %p124_p2, %p123_p1 }
   0x9   :  { %p126_p4 = pnand %p125_p3, %p119_p0 }
   0xb   :  { %129 = shalt.err (!%p126_p4)
}
   0xc   :  { %19 = dma.hbm_to_vmem [thread:$0]  %s203_s0, 128, %s17_s10, [#allocation3]  }
   0xd   :  { %s138_s16 = scalar_lea.vmem %s27_s12, 128  ;;  %p143_p6 = scmp.lt.s32.totalorder %s27_s12, %s27_s12 }
   0xe   :  { %p139_p5 = scmp.ne.s32.totalorder %s27_s12, %s138_s16  ;;  %p144_p7 = scmp.lt.s32.totalorder %s138_s16, %s138_s16 }
  0x10   :  { %p145_p8 = por %p144_p7, %p143_p6 }
  0x12   :  { %p146_p9 = pnand %p145_p8, %p139_p5 }
  0x14   :  { %149 = shalt.err (!%p146_p9)
}
  0x15   :  { %29 = dma.hbm_to_vmem [thread:$0]  %s204_s1, 128, %s27_s12, [#allocation6]  }
  0x16   :  { %170 = dma.done.wait [#allocation3], 128  }
  0x17   :  { %171 = vsyncadd [#allocation3], 4294967168 }
  0x18   :  { %172 = dma.done.wait [#allocation6], 128  }
  0x19   :  { %173 = vsyncadd [#allocation6], 4294967168  ;;  %v36_v0 = vld [vmem:[#allocation2] sm:$0xff]  ;;  %v38_v1 = vld [vmem:[#allocation5] sm:$0xff]  ;;  %vm66_vm0 = vcmask 7168   ;;  %s178_s0 = smov [#allocation7]  }
  0x1a   :  { %v37_v2 = vmul.f32 0.25, %v36_v0  ;;  %v39_v3 = vmul.f32 0.25, %v38_v1  ;;  %s85_s1 = sshll.u32 %s178_s0, 4  ;;  %s86_s1 = int_to_ptr.vmem [resolvable:$true] %s85_s1 }
  0x1b   :  { %s150_s20 = scalar_lea.vmem %s86_s1, 16  ;;  %s154_s21 = scalar_lea.vmem %s86_s1, 32 }
  0x1c   :  { %40 = vmax.xlane.f32.xlu0 %v37_v2  ;;  %p151_p10 = scmp.ne.s32.totalorder %s86_s1, %s150_s20  ;;  %p155_p11 = scmp.lt.s32.totalorder %s86_s1, %s86_s1 }
  0x1d   :  { %p156_p12 = scmp.lt.s32.totalorder %s154_s21, %s150_s20 }
  0x1f   :  { %p157_p13 = por %p156_p12, %p155_p11 }
  0x20   :  { %50 = vmax.xlane.f32.xlu0 %v39_v3 }
  0x21   :  { %p158_p0 = pnand %p157_p13, %p151_p10 }
  0xa5   :  { %v41_v4 = vpop.xlane.xlu0 %40 }
  0xa6   :  { %v42_v5 = vsub.f32 %v37_v2, %v41_v4 }
  0xa8   :  { %v43_v6 = vmul.f32 1.442695, %v42_v5 }
  0xa9   :  { %v51_v7 = vpop.xlane.xlu0 %50 }
  0xaa   :  { %v52_v8 = vsub.f32 %v39_v3, %v51_v7  ;;  %100 = vpow2.f32 %v43_v6 }
  0xac   :  { %v53_v9 = vmul.f32 1.442695, %v52_v8 }
  0xae   :  { %102 = vpow2.f32 %v53_v9 }
  0xb7   :  { %v101_v10 = vpop.eup %100 }
  0xb8   :  { %45 = vadd.xlane.f32.xlu1 %v101_v10 }
  0xbb   :  { %v103_v11 = vpop.eup %102 }
  0xbc   :  { %55 = vadd.xlane.f32.xlu1 %v103_v11 }
 0x141   :  { %v46_v12 = vpop.xlane.xlu1 %45 }
 0x142   :  { %104 = vlog2.f32 %v46_v12 }
 0x145   :  { %v56_v13 = vpop.xlane.xlu1 %55 }
 0x146   :  { %106 = vlog2.f32 %v56_v13 }
 0x147   :  { %108 = vrcp.f32 %v56_v13 }
 0x14f   :  { %v105_v14 = vpop.eup %104 }
 0x150   :  { %v48_v15 = vmul.f32 0.6931472, %v105_v14 }
 0x152   :  { %v49_v18 = vsub.f32 %v42_v5, %v48_v15 }
 0x153   :  { %v107_v16 = vpop.eup %106 }
 0x154   :  { %v58_v17 = vmul.f32 0.6931472, %v107_v16  ;;  %v109_v22 = vpop.eup %108 }
 0x156   :  { %v59_v19 = vsub.f32 %v52_v8, %v58_v17 }
 0x158   :  { %v60_v20 = vsub.f32 %v59_v19, %v49_v18 }
 0x15a   :  { %v61_v21 = vmul.f32 %v103_v11, %v60_v20 }
 0x15c   :  { %62 = vadd.xlane.f32.xlu0 %v61_v21 }
 0x1e5   :  { %v63_v23 = vpop.xlane.xlu0 %62 }
 0x1e6   :  { %v65_v24 = vmul.f32 %v109_v22, %v63_v23 }
 0x1e8   :  { %v67_v25 = vsel %vm66_vm0, %v65_v24, 0.0 }
 0x1e9   :  { %68 = vadd.xlane.f32.xlu1 %v67_v25 }
 0x272   :  { %v69_v26 = vpop.xlane.xlu1 %68 }
 0x273   :  { %v70_v27 = vrot.slane %v69_v26, 4 }
 0x275   :  { %v71_v28 = vadd.f32 %v70_v27, %v69_v26 }
 0x277   :  { %v72_v29 = vrot.slane %v71_v28, 2 }
 0x279   :  { %v73_v30 = vadd.f32 %v72_v29, %v71_v28 }
 0x27b   :  { %v74_v31 = vrot.slane %v73_v30, 1 }
 0x27d   :  { %v75_v32 = vadd.f32 %v74_v31, %v73_v30 }
 0x27f   :  { %95 = vpush %v75_v32 }
 0x2b0   :  { %s96_s19 = spop %95 }
 0x2b1   :  { %v77_v33 = vstv %s96_s19 }
 0x2b2   :  { %78 = vst [vmem:[#allocation7] sm:$0x1] %v77_v33 }
 0x2b3   :  { %161 = shalt.err (!%p158_p0)
}
 0x2b4   :  { %88 = dma.vmem_to_hbm [thread:$0]  %s86_s1, 16, %s205_s2, [#allocation4]  }
 0x2b5   :  { %174 = dma.done.wait [#allocation4], 16  }
 0x2b6   :  { %175 = vsyncadd [#allocation4], 4294967280 }
 0x2b7   :  { %92 = vsyncpa [#allocation3], 1 }
 0x2b8   :  { %93 = vsyncpa [#allocation6], 1 }
 0x2b9   :  { %94 = vsyncpa [#allocation4], 1 }

</bundles_post_ra>
